<compile_context>
chip_gen: v7x
topology: tpu7x:2x2x1
jax: 0.10.0
libtpu: 0.0.40
codegen_flags: <defaults>
</compile_context>

<pallas_src>
import jax
import jax.numpy as jnp
from jax import lax
from jax.experimental import pallas as pl
from jax.experimental.pallas import tpu as pltpu


def _round_up(a: int, b: int) -> int:
    return (a + b - 1) // b * b


def _gating_kernel(x_ref, w_ref, b_ref, xg_ref, o_ref):
    # x_ref : (tm, Dp)   activation rows (full feature dim, matmul operand)
    # w_ref : (tn, Dp)   weight slab, PyTorch (out, in) layout, bf16
    # b_ref : (1,  tn)   bias slice, f32
    # xg_ref: (tm, tn)   activation slice used for the elementwise gate
    # o_ref : (tm, tn)
    x = x_ref[...].astype(jnp.bfloat16)          # native MXU operand dtype
    w = w_ref[...]                               # already bf16
    # x @ W^T : contract both last dims -> PyTorch-layout weight, no transpose.
    pre = lax.dot_general(
        x, w,
        dimension_numbers=(((1,), (1,)), ((), ())),
        preferred_element_type=jnp.float32,
    )
    pre = pre + b_ref[...]                       # f32 bias add
    # sigmoid(p) == 0.5*(tanh(0.5*p)+1): one EUP op instead of exp+reciprocal,
    # which matters when d_model is small and the EUP (not the MXU) binds.
    z = 0.5 * (jnp.tanh(0.5 * pre) + 1.0)
    o_ref[...] = (z * xg_ref[...].astype(jnp.float32)).astype(o_ref.dtype)


def gating_mechanism(x, weight, bias, *, tm=256, tn_tile=512, n_resident_max=1024):
    """sigmoid(Linear(x)) * x.

    x:      (B, S, D)   float array
    weight: (D, D)      PyTorch nn.Linear layout (out_features, in_features)
    bias:   (D,)
    """
    B, S, D = x.shape
    M = B * S

    # ---- tiling -------------------------------------------------------------
    # Feature dim: lane-align to 128.  Keep the whole output dim in one block
    # for small D; tile it (tn output features at a time) for large D so the
    # resident weight slab stays a few MiB (fits v7x's 64 MiB VMEM).
    if D <= n_resident_max:
        tn = _round_up(D, 128)
        d_pad = tn
    else:
        tn = tn_tile                              # multiple of 128
        d_pad = _round_up(D, tn)
    # Row tile: large (>=256) to fill the MXU and amortise the ~0.35us per-step
    # pipeline overhead; clamp for tiny inputs so the block never exceeds M.
    tm = min(tm, _round_up(M, 8))
    m_pad = _round_up(M, tm)

    # ---- pad to lane/tile-aligned shapes (no masked stores in the kernel) ---
    x2d = x.reshape(M, D)
    if (m_pad, d_pad) != (M, D):
        x2d = jnp.pad(x2d, ((0, m_pad - M), (0, d_pad - D)))
    w_k = weight.astype(jnp.bfloat16)             # halves weight HBM/VMEM
    if d_pad != D:
        w_k = jnp.pad(w_k, ((0, d_pad - D), (0, d_pad - D)))
    b_k = bias.astype(jnp.float32).reshape(1, D)
    if d_pad != D:
        b_k = jnp.pad(b_k, ((0, 0), (0, d_pad - D)))

    # Grid: (n tiles, m tiles) with m innermost, so the weight/bias block index
    # is constant across the inner loop and each weight slab is DMA'd once per
    # n tile (Pallas skips re-fetching unchanged blocks -> no Buffered(1) need).
    grid = (d_pad // tn, m_pad // tm)

    out = pl.pallas_call(
        _gating_kernel,
        out_shape=jax.ShapeDtypeStruct((m_pad, d_pad), x.dtype),
        grid_spec=pl.GridSpec(
            grid=grid,
            in_specs=[
                pl.BlockSpec((tm, d_pad), lambda j, i: (i, 0)),  # x rows (matmul)
                pl.BlockSpec((tn, d_pad), lambda j, i: (j, 0)),  # W slab (out,in)
                pl.BlockSpec((1, tn),     lambda j, i: (0, j)),  # bias slice
                pl.BlockSpec((tm, tn),    lambda j, i: (i, j)),  # x slice (gate)
            ],
            out_specs=pl.BlockSpec((tm, tn), lambda j, i: (i, j)),
        ),
        compiler_params=pltpu.CompilerParams(
            dimension_semantics=("parallel", "parallel"),
            vmem_limit_bytes=48 * 1024 * 1024,   # <= ~48 MiB keeps v7x headroom
        ),
    )(x2d, w_k, b_k, x2d)

    if (m_pad, d_pad) != (M, D):
        out = out[:M, :D]
    return out.reshape(B, S, D)
    # TODO(synk): for d_model >~ 8192 also tile the contraction (K) axis with an
    # f32 VMEM accumulator so the (tm, D) activation block keeps fitting VMEM.


def _reference_f32(x, weight, bias):
    # Exact PyTorch-equivalent reference: sigmoid(x @ W^T + b) * x
    pre = jnp.einsum("bsd,od->bso", x, weight) + bias
    return jax.nn.sigmoid(pre) * x


def _reference_bf16(x, weight, bias):
    # Mirrors the kernel's numerics: bf16 matmul operands, f32 accumulation,
    # f32 sigmoid, gate with the original-precision x.
    xb = x.astype(jnp.bfloat16).astype(jnp.float32)
    wb = weight.astype(jnp.bfloat16).astype(jnp.float32)
    pre = jnp.einsum("bsd,od->bso", xb, wb) + bias
    return jax.nn.sigmoid(pre) * x


if __name__ == "__main__":
    key = jax.random.PRNGKey(0)
    kx, kw, kb = jax.random.split(key, 3)

    batch, seq, d_model = 2, 8, 32
    x = jax.random.normal(kx, (batch, seq, d_model), dtype=jnp.float32)

    # Deterministic "nn.Linear(d_model, d_model)" parameters (PyTorch layout).
    bound = 1.0 / (d_model ** 0.5)
    weight = jax.random.uniform(kw, (d_model, d_model), jnp.float32, -bound, bound)
    bias = jax.random.uniform(kb, (d_model,), jnp.float32, -bound, bound)

    out = gating_mechanism(x, weight, bias)
    out = jax.block_until_ready(out)
    assert out.shape == (batch, seq, d_model)

    # Tight check against a reference with the same bf16-input matmul numerics.
    ref_bf16 = _reference_bf16(x, weight, bias)
    assert jnp.allclose(out, ref_bf16, atol=1e-3, rtol=1e-3), "mismatch vs bf16 ref"
    # Loose check against the exact f32 reference (bf16 MXU inputs with f32
    # accumulation shift the result by ~1e-3 at this scale).
    ref_f32 = _reference_f32(x, weight, bias)
    assert jnp.allclose(out, ref_f32, atol=3e-2, rtol=3e-2), "mismatch vs f32 ref"
    print("KERNEL_OK")
</pallas_src>

<mosaic_0001>
module attributes {stable_mosaic.version = 11 : i64} {
  func.func @_gating_kernel(%arg0: i32, %arg1: i32, %arg2: memref<16x128xf32, #tpu.memory_space<vmem>>, %arg3: memref<128x128xbf16, #tpu.memory_space<vmem>>, %arg4: memref<1x128xf32, #tpu.memory_space<vmem>>, %arg5: memref<16x128xf32, #tpu.memory_space<vmem>>, %arg6: memref<16x128xf32, #tpu.memory_space<vmem>>) attributes {dimension_semantics = [#tpu.dimension_semantics<parallel>, #tpu.dimension_semantics<parallel>], iteration_bounds = array<i64: 1, 1>, scalar_prefetch = 0 : i64, scratch_operands = 0 : i64, tpu.core_type = #tpu.core_type<tc>, window_params = [{transform_indices = @transform_0, window_bounds = array<i64: 16, 128>}, {transform_indices = @transform_1, window_bounds = array<i64: 128, 128>}, {transform_indices = @transform_2, window_bounds = array<i64: 1, 128>}, {transform_indices = @transform_3, window_bounds = array<i64: 16, 128>}, {transform_indices = @transform_4, window_bounds = array<i64: 16, 128>}]} {
    %c0 = arith.constant 0 : index
    %c0_0 = arith.constant 0 : index
    %0 = vector.load %arg2[%c0, %c0_0] : memref<16x128xf32, #tpu.memory_space<vmem>>, vector<16x128xf32>
    %1 = arith.truncf %0 : vector<16x128xf32> to vector<16x128xbf16>
    %c0_1 = arith.constant 0 : index
    %c0_2 = arith.constant 0 : index
    %2 = vector.load %arg3[%c0_1, %c0_2] : memref<128x128xbf16, #tpu.memory_space<vmem>>, vector<128x128xbf16>
    %cst = arith.constant dense<0.000000e+00> : vector<16x128xf32>
    %3 = tpu.matmul %1, %2, %cst {dimension_numbers = #tpu.dot_dimension_numbers<[1], [1], [0], [0], [0, 0, 1, 0], [], []>} : vector<16x128xbf16>, vector<128x128xbf16>, vector<16x128xf32> -> vector<16x128xf32>
    %c0_3 = arith.constant 0 : index
    %c0_4 = arith.constant 0 : index
    %4 = vector.load %arg4[%c0_3, %c0_4] : memref<1x128xf32, #tpu.memory_space<vmem>>, vector<1x128xf32>
    %5 = vector.broadcast %4 : vector<1x128xf32> to vector<16x128xf32>
    %6 = arith.addf %3, %5 : vector<16x128xf32>
    %cst_5 = arith.constant 5.000000e-01 : f32
    %7 = vector.broadcast %cst_5 : f32 to vector<16x128xf32>
    %8 = arith.mulf %7, %6 : vector<16x128xf32>
    %9 = math.tanh %8 : vector<16x128xf32>
    %cst_6 = arith.constant 1.000000e+00 : f32
    %10 = vector.broadcast %cst_6 : f32 to vector<16x128xf32>
    %11 = arith.addf %9, %10 : vector<16x128xf32>
    %cst_7 = arith.constant 5.000000e-01 : f32
    %12 = vector.broadcast %cst_7 : f32 to vector<16x128xf32>
    %13 = arith.mulf %12, %11 : vector<16x128xf32>
    %c0_8 = arith.constant 0 : index
    %c0_9 = arith.constant 0 : index
    %14 = vector.load %arg5[%c0_8, %c0_9] : memref<16x128xf32, #tpu.memory_space<vmem>>, vector<16x128xf32>
    %15 = arith.mulf %13, %14 : vector<16x128xf32>
    %c0_10 = arith.constant 0 : index
    %c0_11 = arith.constant 0 : index
    %16 = vector.load %arg6[%c0_10, %c0_11] : memref<16x128xf32, #tpu.memory_space<vmem>>, vector<16x128xf32>
    tpu.vector_store %arg6[%c0_10, %c0_11], %15 {strides = array<i32>} : memref<16x128xf32, #tpu.memory_space<vmem>>, vector<16x128xf32>,
    return
  }
  func.func @transform_0(%arg0: i32, %arg1: i32) -> (i32, i32) {
    %c0_i32 = arith.constant 0 : i32
    %c0_i32_0 = arith.constant 0 : i32
    return %arg1, %c0_i32 : i32, i32
  }
  func.func @transform_1(%arg0: i32, %arg1: i32) -> (i32, i32) {
    %c0_i32 = arith.constant 0 : i32
    %c0_i32_0 = arith.constant 0 : i32
    return %arg0, %c0_i32 : i32, i32
  }
  func.func @transform_2(%arg0: i32, %arg1: i32) -> (i32, i32) {
    %c0_i32 = arith.constant 0 : i32
    %c0_i32_0 = arith.constant 0 : i32
    return %c0_i32, %arg0 : i32, i32
  }
  func.func @transform_3(%arg0: i32, %arg1: i32) -> (i32, i32) {
    %c0_i32 = arith.constant 0 : i32
    return %arg1, %arg0 : i32, i32
  }
  func.func @transform_4(%arg0: i32, %arg1: i32) -> (i32, i32) {
    %c0_i32 = arith.constant 0 : i32
    return %arg1, %arg0 : i32, i32
  }
}

</mosaic_0001>

<bundles_post_ra>
// kernel: tpu_custom_call.1
= control target key start
LH: loop header
LB: loop body
LE: loop exit
PB: predicated region body
PF: predicated region fallthrough
CT: control target
= control target key end

     0   :  { %9 = vsyncpa [#allocation3], 0  ;;  %s456_s0 = inlined_call_operand.hbm [shape: f32[16,128], index: 0, kind: input, shape index: {}]   ;;  %s457_s1 = inlined_call_operand.hbm [shape: bf16[128,128], index: 1, kind: input, shape index: {}]   ;;  %s458_s2 = inlined_call_operand.vmem [shape: f32[1,128], index: 2, kind: input, shape index: {}]   ;;  %s459_s3 = inlined_call_operand.hbm [shape: f32[16,128], index: 3, kind: input, shape index: {}]   ;;  %s460_s4 = inlined_call_operand.hbm [shape: f32[16,128], index: 4, kind: output, shape index: {}]  }
   0x1   :  { %10 = vsyncpa [#allocation6], 0 }
   0x2   :  { %11 = vsyncpa [#allocation4], 0  ;;  %s361_s15 = smov [#allocation5]   ;;  %s267_s19 = scalar_lea.hbm %s457_s1, 1024 }
   0x3   :  { %s29_s16 = sshll.u32 %s361_s15, 4  ;;  %p268_p0 = scmp.ne.s32.totalorder %s457_s1, %s267_s19  ;;  %s30_s16 = int_to_ptr.vmem [resolvable:$true] %s29_s16 }
   0x4   :  { %p271_p1 = scmp.lt.u32.totalorder %s267_s19, %s457_s1 }
   0x6   :  { %p273_p2 = pnand %p271_p1, %p268_p0 }
   0x8   :  { %276 = shalt.err (!%p273_p2)
}
   0x9   :  { %s277_s24 = scalar_lea.vmem %s30_s16, 1024  ;;  %p282_p4 = scmp.lt.s32.totalorder %s30_s16, %s30_s16 }
   0xa   :  { %p278_p3 = scmp.ne.s32.totalorder %s30_s16, %s277_s24  ;;  %p283_p5 = scmp.lt.s32.totalorder %s277_s24, %s277_s24 }
   0xc   :  { %p284_p6 = por %p283_p5, %p282_p4 }
   0xe   :  { %p285_p7 = pnand %p284_p6, %p278_p3 }
  0x10   :  { %288 = shalt.err (!%p285_p7)
}
  0x11   :  { %s362_s25 = smov 64   ;;  %s363_s26 = smov 4  }
  0x12   :  { %35 = dma.hbm_to_vmem [thread:$0]  %s457_s1, 1024, %s30_s16, [#allocation6], %s362_s25, %s362_s25, %s363_s26  }
  0x13   :  { %s364_s29 = smov [#allocation2]   ;;  %s289_s7 = scalar_lea.hbm %s456_s0, 256 }
  0x14   :  { %s17_s30 = sshll.u32 %s364_s29, 4  ;;  %p290_p8 = scmp.ne.s32.totalorder %s456_s0, %s289_s7  ;;  %s18_s30 = int_to_ptr.vmem [resolvable:$true] %s17_s30 }
  0x15   :  { %p293_p9 = scmp.lt.u32.totalorder %s289_s7, %s456_s0 }
  0x17   :  { %p295_p10 = pnand %p293_p9, %p290_p8 }
  0x19   :  { %298 = shalt.err (!%p295_p10)
}
  0x1a   :  { %s299_s12 = scalar_lea.vmem %s18_s30, 256  ;;  %p304_p12 = scmp.lt.s32.totalorder %s18_s30, %s18_s30 }
  0x1b   :  { %p300_p11 = scmp.ne.s32.totalorder %s18_s30, %s299_s12  ;;  %p305_p13 = scmp.lt.s32.totalorder %s299_s12, %s299_s12 }
  0x1d   :  { %p306_p0 = por %p305_p13, %p304_p12 }
  0x1f   :  { %p307_p1 = pnand %p306_p0, %p300_p11 }
  0x21   :  { %310 = shalt.err (!%p307_p1)
}
  0x22   :  { %s365_s1 = smov 128   ;;  %s366_s13 = smov 8  }
  0x23   :  { %23 = dma.hbm_to_vmem [thread:$0]  %s456_s0, 256, %s18_s30, [#allocation3], %s365_s1, %s365_s1, %s366_s13  }
  0x24   :  { %s367_s16 = smov [#allocation7]   ;;  %s311_s20 = scalar_lea.hbm %s459_s3, 256 }
  0x25   :  { %s43_s17 = sshll.u32 %s367_s16, 4  ;;  %p312_p2 = scmp.ne.s32.totalorder %s459_s3, %s311_s20  ;;  %s44_s17 = int_to_ptr.vmem [resolvable:$true] %s43_s17 }
  0x26   :  { %p315_p3 = scmp.lt.u32.totalorder %s311_s20, %s459_s3 }
  0x28   :  { %p317_p4 = pnand %p315_p3, %p312_p2 }
  0x2a   :  { %320 = shalt.err (!%p317_p4)
}
  0x2b   :  { %s321_s25 = scalar_lea.vmem %s44_s17, 256  ;;  %p326_p6 = scmp.lt.s32.totalorder %s44_s17, %s44_s17 }
  0x2c   :  { %p322_p5 = scmp.ne.s32.totalorder %s44_s17, %s321_s25  ;;  %p327_p7 = scmp.lt.s32.totalorder %s321_s25, %s321_s25 }
  0x2e   :  { %p328_p8 = por %p327_p7, %p326_p6 }
  0x30   :  { %p329_p9 = pnand %p328_p8, %p322_p5 }
  0x32   :  { %332 = shalt.err (!%p329_p9)
}
  0x33   :  { %49 = dma.hbm_to_vmem [thread:$0]  %s459_s3, 256, %s44_s17, [#allocation6], %s365_s1, %s365_s1, %s366_s13  }
  0x34   :  { %355 = dma.done.wait [#allocation3], 256  }
  0x35   :  { %356 = vsyncadd [#allocation3], 4294967040 }
  0x36   :  { %357 = dma.done.wait [#allocation6], 1280  }
  0x37   :  { %358 = vsyncadd [#allocation6], 4294966016  ;;  %v368_v0 = vmov 0.0   ;;  %vm369_vm0 = vmmov 0   ;;  %v255_v1 = vld [vmem:[#allocation5] sm:$0xff]   ;;  %v256_v2 = vld [vmem:[#allocation5 + $0x8] sm:$0xff]  }
  0x38   :  { %225 = vmatprep.subr.bf16.mxu0 %v368_v0  ;;  %241 = vmatprep.mubr.msk.bf16.mxu0 %vm369_vm0, %v368_v0  ;;  %v257_v3 = vld [vmem:[#allocation5 + $0x10] sm:$0xff]   ;;  %v258_v4 = vld [vmem:[#allocation5 + $0x18] sm:$0xff]   ;;  %v259_v5 = vld [vmem:[#allocation5 + $0x20] sm:$0xff]   ;;  %s370_s28 = smov [#allocation8]  }
  0x39   :  { %226 = vmatpush3.bf16.xpose.msra.mxu0 %v255_v1  ;;  %v260_v6 = vld [vmem:[#allocation5 + $0x28] sm:$0xff]   ;;  %v261_v7 = vld [vmem:[#allocation5 + $0x30] sm:$0xff]   ;;  %v262_v8 = vld [vmem:[#allocation5 + $0x38] sm:$0xff]   ;;  %s194_s29 = sshll.u32 %s370_s28, 4  ;;  %s195_s29 = int_to_ptr.vmem [resolvable:$true] %s194_s29 }
  0x3a   :  { %227 = vmatprep.subr.bf16.mxu0 %v368_v0  ;;  %v60_v9 = vld [vmem:[#allocation2] sm:$0xff]  ;;  %v61_v10 = vld [vmem:[#allocation2 + $0x8] sm:$0xff]  ;;  %v183_v24 = vld [vmem:[#allocation7] sm:$0xff]  ;;  %p338_p11 = scmp.lt.s32.totalorder %s195_s29, %s195_s29 }
  0x3b   :  { %v62_v11 = vpack.c.bf16 %v61_v10, %v60_v9  ;;  %v207_v12 = vld [vmem:[%s458_s2] ss:$0 sm:$0xff]  ;;  %v184_v27 = vld [vmem:[#allocation7 + $0x8] sm:$0xff]  ;;  %s333_s2 = scalar_lea.vmem %s195_s29, 256 }
  0x3c   :  { %p334_p10 = scmp.ne.s32.totalorder %s195_s29, %s333_s2  ;;  %p339_p12 = scmp.lt.s32.totalorder %s333_s2, %s333_s2 }
  0x3e   :  { %p340_p13 = por %p339_p12, %p338_p11 }
  0x40   :  { %p341_p0 = pnand %p340_p13, %p334_p10 }
  0x41   :  { %228 = vmatpush3.bf16.xpose.msra.mxu0 %v256_v2 }
  0x42   :  { %229 = vmatprep.subr.bf16.mxu0 %v368_v0 }
  0x49   :  { %230 = vmatpush3.bf16.xpose.msra.mxu0 %v257_v3 }
  0x4a   :  { %231 = vmatprep.subr.bf16.mxu0 %v368_v0 }
  0x51   :  { %232 = vmatpush3.bf16.xpose.msra.mxu0 %v258_v4 }
  0x52   :  { %233 = vmatprep.subr.bf16.mxu0 %v368_v0 }
  0x59   :  { %234 = vmatpush3.bf16.xpose.msra.mxu0 %v259_v5 }
  0x5a   :  { %235 = vmatprep.subr.bf16.mxu0 %v368_v0 }
  0x61   :  { %236 = vmatpush3.bf16.xpose.msra.mxu0 %v260_v6 }
  0x62   :  { %237 = vmatprep.subr.bf16.mxu0 %v368_v0 }
  0x69   :  { %238 = vmatpush3.bf16.xpose.msra.mxu0 %v261_v7 }
  0x6a   :  { %239 = vmatprep.subr.bf16.mxu0 %v368_v0 }
  0x71   :  { %240 = vmatpush3.bf16.xpose.msra.mxu0 %v262_v8 }
  0x78   :  { %242 = vmatmul.mubr.bf16.vlgmr.msra.gmra.mrb[0].mxu0 %v62_v11 }
 0x14b   :  { %v168_v13 = vpop.f32.mrb[0].mxu0 }
 0x14c   :  { %v169_v14 = vadd.f32 %v207_v12, %v168_v13  ;;  %v243_v15 = vpop.f32.mrb[1].mxu0 }
 0x14d   :  { %v171_v16 = vpop.f32.mrb[2].mxu0 }
 0x14e   :  { %v175_v17 = vmul.f32 0.5, %v169_v14  ;;  %v172_v18 = vadd.f32 %v207_v12, %v171_v16  ;;  %v244_v19 = vpop.f32.mrb[3].mxu0 }
 0x150   :  { %263 = vtanh.f32 %v175_v17  ;;  %v176_v20 = vmul.f32 0.5, %v172_v18 }
 0x152   :  { %265 = vtanh.f32 %v176_v20 }
 0x15a   :  { %v264_v21 = vpop.eup %263 }
 0x15b   :  { %v179_v22 = vadd.f32 1.0, %v264_v21 }
 0x15c   :  { %v266_v23 = vpop.eup %265 }
 0x15d   :  { %v181_v25 = vmul.f32 0.5, %v179_v22  ;;  %v180_v26 = vadd.f32 1.0, %v266_v23 }
 0x15f   :  { %v182_v28 = vmul.f32 0.5, %v180_v26  ;;  %v185_v29 = vmul.f32 %v183_v24, %v181_v25 }
 0x161   :  { %v186_v30 = vmul.f32 %v184_v27, %v182_v28  ;;  %187 = vst [vmem:[#allocation8] sm:$0xff] %v185_v29 }
 0x163   :  { %188 = vst [vmem:[#allocation8 + $0x8] sm:$0xff] %v186_v30 }
 0x164   :  { %344 = shalt.err (!%p341_p0)
}
 0x165   :  { %s345_s6 = scalar_lea.hbm %s460_s4, 256 }
 0x166   :  { %p346_p1 = scmp.ne.s32.totalorder %s460_s4, %s345_s6  ;;  %p349_p2 = scmp.lt.u32.totalorder %s345_s6, %s460_s4 }
 0x168   :  { %p351_p3 = pnand %p349_p2, %p346_p1 }
 0x16a   :  { %354 = shalt.err (!%p351_p3)
}
 0x16b   :  { %200 = dma.vmem_to_hbm [thread:$0]  %s195_s29, 256, %s460_s4, [#allocation4], %s365_s1, %s365_s1, %s366_s13  }
 0x16c   :  { %359 = dma.done.wait [#allocation4], 256  }
 0x16d   :  { %360 = vsyncadd [#allocation4], 4294967040 }
 0x16e   :  { %204 = vsyncpa [#allocation3], 1 }
 0x16f   :  { %205 = vsyncpa [#allocation6], 1 }
 0x170   :  { %206 = vsyncpa [#allocation4], 1 }

</bundles_post_ra>
